<compile_context>
chip_gen: v7x
topology: tpu7x:2x2x1
jax: 0.10.0
libtpu: 0.0.40
codegen_flags: <defaults>
</compile_context>

<pallas_src>
import functools

import jax
import jax.numpy as jnp
from jax import lax
from jax.experimental import pallas as pl
from jax.experimental.pallas import tpu as pltpu


def _frelu_kernel(x_ref, p_ref, m_ref, o_ref, *, W):
    # x_ref: (1, Cb, H*W)  channel-blocked input slab (lane dim = H*W, lane-dense)
    # p_ref: (Cb, 10)      BN-folded depthwise weights (cols 0..8) + bias (col 9)
    # m_ref: (4, H*W)      {0,1} border masks: [left-col, right-col, top-row, bottom-row]
    # o_ref: (1, Cb, H*W)
    x = x_ref[0].astype(jnp.float32)          # (Cb, HW)
    p = p_ref[...].astype(jnp.float32)        # (Cb, 10)
    m = m_ref[...]                            # (4, HW) f32
    HW = x.shape[1]

    # Per-channel tap scalars as (Cb, 1) lane-broadcast columns (hoisted, used once each).
    w = [p[:, k:k + 1] for k in range(9)]
    bias = p[:, 9:10]

    # Column neighbours x[i, j-1] / x[i, j+1]: lane roll (XLU) + border-mask multiply.
    left = pltpu.roll(x, shift=1, axis=1) * m[0:1, :]
    right = pltpu.roll(x, shift=HW - 1, axis=1) * m[1:2, :]

    # Pre-combine each kernel row (3 taps) before shifting it vertically: 4 rolls total.
    row_top = w[0] * left + w[1] * x + w[2] * right
    row_mid = w[3] * left + w[4] * x + w[5] * right + bias
    row_bot = w[6] * left + w[7] * x + w[8] * right

    conv = (row_mid
            + pltpu.roll(row_top, shift=W, axis=1) * m[2:3, :]       # from row i-1
            + pltpu.roll(row_bot, shift=HW - W, axis=1) * m[3:4, :]) # from row i+1

    o_ref[0] = jnp.maximum(x, conv).astype(o_ref.dtype)


def _pick_channel_block(C, HW, itemsize, target_bytes):
    """Largest Cb with Cb | C, (Cb % 8 == 0 or Cb == C), block bytes <= target."""
    max_cb = max(1, target_bytes // (HW * itemsize))
    if C <= max_cb:
        return C
    best = 0
    cb = 8
    while cb <= max_cb:
        if C % cb == 0:
            best = cb
        cb += 8
    if best:
        return best
    return 8 if C % 8 == 0 else C


def frelu_pallas(x_nchw, conv_w, gamma, beta, running_mean, running_var, eps=1e-5,
                 block_target_bytes=1 << 20):
    """FReLU forward.  x_nchw: (N, C, H, W); conv_w: (C, 1, 3, 3) depthwise weights."""
    N, C, H, W = x_nchw.shape
    HW = H * W

    # Fold inference BatchNorm into the depthwise conv (per-channel affine).
    scale = gamma / jnp.sqrt(running_var + eps)                       # (C,)
    bias = beta - running_mean * scale                                # (C,)
    w = (conv_w[:, 0, :, :] * scale[:, None, None]).reshape(C, 9)     # (C, 9)
    params = jnp.concatenate([w, bias[:, None]], axis=1).astype(jnp.float32)  # (C, 10)

    # Border masks on the flattened H*W axis (computed once on host/XLA; no mod in-kernel).
    j = jnp.arange(HW)
    masks = jnp.stack([
        (j % W) != 0,            # valid for left  neighbour x[i, j-1]
        (j % W) != (W - 1),      # valid for right neighbour x[i, j+1]
        j >= W,                  # valid for top    neighbour x[i-1, j]
        j < (H - 1) * W,         # valid for bottom neighbour x[i+1, j]
    ]).astype(jnp.float32)                                            # (4, HW)

    cb = _pick_channel_block(C, HW, x_nchw.dtype.itemsize, block_target_bytes)
    x_flat = x_nchw.reshape(N, C, HW)        # free reshape of contiguous NCHW

    out = pl.pallas_call(
        functools.partial(_frelu_kernel, W=W),
        out_shape=jax.ShapeDtypeStruct((N, C, HW), x_nchw.dtype),
        grid=(N, C // cb),
        in_specs=[
            pl.BlockSpec((1, cb, HW), lambda n, c: (n, c, 0)),   # input slab
            pl.BlockSpec((cb, 10), lambda n, c: (c, 0)),         # folded weights+bias
            pl.BlockSpec((4, HW), lambda n, c: (0, 0)),          # border masks
        ],
        out_specs=pl.BlockSpec((1, cb, HW), lambda n, c: (n, c, 0)),
        compiler_params=pltpu.CompilerParams(
            dimension_semantics=("parallel", "parallel"),
            vmem_limit_bytes=32 * 1024 * 1024),
    )(x_flat, params, masks)
    return out.reshape(N, C, H, W)


def frelu_reference(x_nchw, conv_w, gamma, beta, running_mean, running_var, eps=1e-5):
    """Pure-JAX reference (depthwise conv via feature_group_count)."""
    C = x_nchw.shape[1]
    conv = lax.conv_general_dilated(
        x_nchw, conv_w,
        window_strides=(1, 1), padding=((1, 1), (1, 1)),
        dimension_numbers=("NCHW", "OIHW", "NCHW"),
        feature_group_count=C,
    )
    scale = (gamma / jnp.sqrt(running_var + eps)).reshape(1, C, 1, 1)
    bias = (beta - running_mean * gamma / jnp.sqrt(running_var + eps)).reshape(1, C, 1, 1)
    return jnp.maximum(x_nchw, conv * scale + bias)


def _make_case(key, N, C, H, W):
    ks = jax.random.split(key, 6)
    x = jax.random.normal(ks[0], (N, C, H, W), dtype=jnp.float32)
    conv_w = jax.random.normal(ks[1], (C, 1, 3, 3), dtype=jnp.float32) * 0.3
    gamma = 1.0 + 0.1 * jax.random.normal(ks[2], (C,), dtype=jnp.float32)
    beta = 0.1 * jax.random.normal(ks[3], (C,), dtype=jnp.float32)
    mean = 0.1 * jax.random.normal(ks[4], (C,), dtype=jnp.float32)
    var = 1.0 + 0.1 * jax.random.uniform(ks[5], (C,), dtype=jnp.float32)
    return x, conv_w, gamma, beta, mean, var


if __name__ == "__main__":
    # Primary case (module-consistent small shapes).
    args = _make_case(jax.random.PRNGKey(0), 2, 4, 16, 16)
    out = jax.block_until_ready(frelu_pallas(*args))
    ref = frelu_reference(*args)
    assert out.shape == args[0].shape
    assert jnp.allclose(out, ref, atol=1e-4, rtol=1e-4), "mismatch vs reference (16x16)"

    # Border / mask coverage: W not a multiple of 8 (H*W still lane-aligned), C blocked at 8.
    args2 = _make_case(jax.random.PRNGKey(1), 2, 8, 16, 24)
    out2 = jax.block_until_ready(frelu_pallas(*args2))
    ref2 = frelu_reference(*args2)
    assert jnp.allclose(out2, ref2, atol=1e-4, rtol=1e-4), "mismatch vs reference (16x24)"

    print("KERNEL_OK")
</pallas_src>

<mosaic_0001>
module attributes {stable_mosaic.version = 11 : i64} {
  func.func @_frelu_kernel(%arg0: i32, %arg1: i32, %arg2: memref<1x4x256xf32, #tpu.memory_space<vmem>>, %arg3: memref<4x10xf32, #tpu.memory_space<vmem>>, %arg4: memref<4x256xf32, #tpu.memory_space<vmem>>, %arg5: memref<1x4x256xf32, #tpu.memory_space<vmem>>) attributes {dimension_semantics = [#tpu.dimension_semantics<parallel>, #tpu.dimension_semantics<parallel>], iteration_bounds = array<i64: 2, 1>, scalar_prefetch = 0 : i64, scratch_operands = 0 : i64, tpu.core_type = #tpu.core_type<tc>, window_params = [{transform_indices = @transform_0, window_bounds = array<i64: 1, 4, 256>}, {transform_indices = @transform_1, window_bounds = array<i64: 4, 10>}, {pipeline_mode = #tpu.pipeline_mode<synchronous>, transform_indices = @transform_2, window_bounds = array<i64: 4, 256>}, {transform_indices = @transform_3, window_bounds = array<i64: 1, 4, 256>}]} {
    %c0 = arith.constant 0 : index
    %c0_0 = arith.constant 0 : index
    %c0_1 = arith.constant 0 : index
    %0 = vector.load %arg2[%c0, %c0_0, %c0_1] : memref<1x4x256xf32, #tpu.memory_space<vmem>>, vector<1x4x256xf32>
    %1 = vector.shape_cast %0 : vector<1x4x256xf32> to vector<4x256xf32>
    %c0_2 = arith.constant 0 : index
    %c0_3 = arith.constant 0 : index
    %2 = vector.load %arg3[%c0_2, %c0_3] : memref<4x10xf32, #tpu.memory_space<vmem>>, vector<4x10xf32>
    %c0_4 = arith.constant 0 : index
    %c0_5 = arith.constant 0 : index
    %3 = vector.load %arg4[%c0_4, %c0_5] : memref<4x256xf32, #tpu.memory_space<vmem>>, vector<4x256xf32>
    %4 = vector.extract_strided_slice %2 {offsets = [0, 0], sizes = [4, 1], strides = [1, 1]} : vector<4x10xf32> to vector<4x1xf32>
    %5 = vector.extract_strided_slice %2 {offsets = [0, 1], sizes = [4, 1], strides = [1, 1]} : vector<4x10xf32> to vector<4x1xf32>
    %6 = vector.extract_strided_slice %2 {offsets = [0, 2], sizes = [4, 1], strides = [1, 1]} : vector<4x10xf32> to vector<4x1xf32>
    %7 = vector.extract_strided_slice %2 {offsets = [0, 3], sizes = [4, 1], strides = [1, 1]} : vector<4x10xf32> to vector<4x1xf32>
    %8 = vector.extract_strided_slice %2 {offsets = [0, 4], sizes = [4, 1], strides = [1, 1]} : vector<4x10xf32> to vector<4x1xf32>
    %9 = vector.extract_strided_slice %2 {offsets = [0, 5], sizes = [4, 1], strides = [1, 1]} : vector<4x10xf32> to vector<4x1xf32>
    %10 = vector.extract_strided_slice %2 {offsets = [0, 6], sizes = [4, 1], strides = [1, 1]} : vector<4x10xf32> to vector<4x1xf32>
    %11 = vector.extract_strided_slice %2 {offsets = [0, 7], sizes = [4, 1], strides = [1, 1]} : vector<4x10xf32> to vector<4x1xf32>
    %12 = vector.extract_strided_slice %2 {offsets = [0, 8], sizes = [4, 1], strides = [1, 1]} : vector<4x10xf32> to vector<4x1xf32>
    %13 = vector.extract_strided_slice %2 {offsets = [0, 9], sizes = [4, 1], strides = [1, 1]} : vector<4x10xf32> to vector<4x1xf32>
    %c1_i32 = arith.constant 1 : i32
    %14 = tpu.dynamic_rotate %1 by %c1_i32 dim 1 : vector<4x256xf32>, i32 -> vector<4x256xf32>
    %15 = vector.extract_strided_slice %3 {offsets = [0, 0], sizes = [1, 256], strides = [1, 1]} : vector<4x256xf32> to vector<1x256xf32>
    %16 = vector.broadcast %15 : vector<1x256xf32> to vector<4x256xf32>
    %17 = arith.mulf %14, %16 : vector<4x256xf32>
    %c255_i32 = arith.constant 255 : i32
    %18 = tpu.dynamic_rotate %1 by %c255_i32 dim 1 : vector<4x256xf32>, i32 -> vector<4x256xf32>
    %19 = vector.extract_strided_slice %3 {offsets = [1, 0], sizes = [1, 256], strides = [1, 1]} : vector<4x256xf32> to vector<1x256xf32>
    %20 = vector.broadcast %19 : vector<1x256xf32> to vector<4x256xf32>
    %21 = arith.mulf %18, %20 : vector<4x256xf32>
    %22 = vector.broadcast %4 : vector<4x1xf32> to vector<4x256xf32>
    %23 = arith.mulf %22, %17 : vector<4x256xf32>
    %24 = vector.broadcast %5 : vector<4x1xf32> to vector<4x256xf32>
    %25 = arith.mulf %24, %1 : vector<4x256xf32>
    %26 = arith.addf %23, %25 : vector<4x256xf32>
    %27 = vector.broadcast %6 : vector<4x1xf32> to vector<4x256xf32>
    %28 = arith.mulf %27, %21 : vector<4x256xf32>
    %29 = arith.addf %26, %28 : vector<4x256xf32>
    %30 = vector.broadcast %7 : vector<4x1xf32> to vector<4x256xf32>
    %31 = arith.mulf %30, %17 : vector<4x256xf32>
    %32 = vector.broadcast %8 : vector<4x1xf32> to vector<4x256xf32>
    %33 = arith.mulf %32, %1 : vector<4x256xf32>
    %34 = arith.addf %31, %33 : vector<4x256xf32>
    %35 = vector.broadcast %9 : vector<4x1xf32> to vector<4x256xf32>
    %36 = arith.mulf %35, %21 : vector<4x256xf32>
    %37 = arith.addf %34, %36 : vector<4x256xf32>
    %38 = vector.broadcast %13 : vector<4x1xf32> to vector<4x256xf32>
    %39 = arith.addf %37, %38 : vector<4x256xf32>
    %40 = vector.broadcast %10 : vector<4x1xf32> to vector<4x256xf32>
    %41 = arith.mulf %40, %17 : vector<4x256xf32>
    %42 = vector.broadcast %11 : vector<4x1xf32> to vector<4x256xf32>
    %43 = arith.mulf %42, %1 : vector<4x256xf32>
    %44 = arith.addf %41, %43 : vector<4x256xf32>
    %45 = vector.broadcast %12 : vector<4x1xf32> to vector<4x256xf32>
    %46 = arith.mulf %45, %21 : vector<4x256xf32>
    %47 = arith.addf %44, %46 : vector<4x256xf32>
    %c16_i32 = arith.constant 16 : i32
    %48 = tpu.dynamic_rotate %29 by %c16_i32 dim 1 : vector<4x256xf32>, i32 -> vector<4x256xf32>
    %49 = vector.extract_strided_slice %3 {offsets = [2, 0], sizes = [1, 256], strides = [1, 1]} : vector<4x256xf32> to vector<1x256xf32>
    %50 = vector.broadcast %49 : vector<1x256xf32> to vector<4x256xf32>
    %51 = arith.mulf %48, %50 : vector<4x256xf32>
    %52 = arith.addf %39, %51 : vector<4x256xf32>
    %c240_i32 = arith.constant 240 : i32
    %53 = tpu.dynamic_rotate %47 by %c240_i32 dim 1 : vector<4x256xf32>, i32 -> vector<4x256xf32>
    %54 = vector.extract_strided_slice %3 {offsets = [3, 0], sizes = [1, 256], strides = [1, 1]} : vector<4x256xf32> to vector<1x256xf32>
    %55 = vector.broadcast %54 : vector<1x256xf32> to vector<4x256xf32>
    %56 = arith.mulf %53, %55 : vector<4x256xf32>
    %57 = arith.addf %52, %56 : vector<4x256xf32>
    %58 = arith.maximumf %1, %57 : vector<4x256xf32>
    %c0_6 = arith.constant 0 : index
    %c0_7 = arith.constant 0 : index
    %c0_8 = arith.constant 0 : index
    %59 = vector.load %arg5[%c0_6, %c0_7, %c0_8] : memref<1x4x256xf32, #tpu.memory_space<vmem>>, vector<1x4x256xf32>
    %60 = vector.shape_cast %59 : vector<1x4x256xf32> to vector<4x256xf32>
    %61 = vector.shape_cast %58 : vector<4x256xf32> to vector<1x4x256xf32>
    tpu.vector_store %arg5[%c0_6, %c0_7, %c0_8], %61 {strides = array<i32>} : memref<1x4x256xf32, #tpu.memory_space<vmem>>, vector<1x4x256xf32>,
    return
  }
  func.func @transform_0(%arg0: i32, %arg1: i32) -> (i32, i32, i32) {
    %c0_i32 = arith.constant 0 : i32
    %c0_i32_0 = arith.constant 0 : i32
    return %arg0, %arg1, %c0_i32 : i32, i32, i32
  }
  func.func @transform_1(%arg0: i32, %arg1: i32) -> (i32, i32) {
    %c0_i32 = arith.constant 0 : i32
    %c0_i32_0 = arith.constant 0 : i32
    return %arg1, %c0_i32 : i32, i32
  }
  func.func @transform_2(%arg0: i32, %arg1: i32) -> (i32, i32) {
    %c0_i32 = arith.constant 0 : i32
    %c0_i32_0 = arith.constant 0 : i32
    %c0_i32_1 = arith.constant 0 : i32
    return %c0_i32, %c0_i32_0 : i32, i32
  }
  func.func @transform_3(%arg0: i32, %arg1: i32) -> (i32, i32, i32) {
    %c0_i32 = arith.constant 0 : i32
    %c0_i32_0 = arith.constant 0 : i32
    return %arg0, %arg1, %c0_i32 : i32, i32, i32
  }
}

</mosaic_0001>

<bundles_post_ra>
// kernel: tpu_custom_call.1
= control target key start
LH: loop header
LB: loop body
LE: loop exit
PB: predicated region body
PF: predicated region fallthrough
CT: control target
= control target key end

     0   :  { %8 = vsyncpa [#allocation3], 0  ;;  %s1191_s0 = inlined_call_operand.hbm [shape: f32[2,4,256], index: 0, kind: input, shape index: {}]   ;;  %s1192_s1 = inlined_call_operand.hbm [shape: f32[4,10], index: 1, kind: input, shape index: {}]   ;;  %s1193_s2 = inlined_call_operand.hbm [shape: f32[4,256], index: 2, kind: input, shape index: {}]   ;;  %s1194_s3 = inlined_call_operand.hbm [shape: f32[2,4,256], index: 3, kind: output, shape index: {}]  }
   0x1   :  { %10 = vsyncpa [#allocation3 + $0x1], 0 }
   0x2   :  { %11 = vsyncpa [#allocation6], 0 }
   0x3   :  { %12 = vsyncpa [#allocation4], 0 }
   0x4   :  { %14 = vsyncpa [#allocation4 + $0x1], 0  ;;  %s901_s12 = smov 0   ;;  %s903_s13 = smov 0  }
   0x5   :  { %s905_s14 = smov 0   ;;  %s907_s15 = smov 0  }
   0x6   :  { %s909_s16 = smov 0   ;;  %s911_s17 = smov 0  }
   0x7 LB: > { %s559_s18 = sadd.s32 4294967295, %s861_s17   ;;  %s560_s19 = sadd.s32 4294967294, %s861_s17   ;;  %s861_s17 = sphi %s911_s17, %s20_s17   ;;  %s857_s16 = sphi %s909_s16, %s1217_s16   ;;  %s853_s15 = sphi %s907_s15, %s1216_s15   ;;  %s849_s14 = sphi %s905_s14, %s1215_s14   ;;  %s845_s13 = sphi %s903_s13, %s1214_s13   ;;  %s841_s12 = sphi %s901_s12, %s1213_s12  }
   0x8   : > { %p54_p0 = scmp.ne.s32.totalorder %s845_s13, %s841_s12  ;;  %p935_p1 = scmp.eq.s32.totalorder %s559_s18, 0 }
   0x9   : > { %p939_p2 = scmp.eq.s32.totalorder %s559_s18, 1  ;;  %p133_p3 = scmp.eq.s32.totalorder %s560_s19, 1 }
   0xa   : > { %s1199_s20 = scalar_select %p935_p1, 1, 0 }
   0xb   : > { %s1200_s21 = scalar_select %p939_p2, 1, 0 }
   0xc   : > { %p945_p4 = por %p935_p1, %p54_p0  ;;  %p561_p5 = scmp.ge.s32.totalorder %s861_s17, 1 }
   0xd   : > { %p950_p6 = por %p133_p3, %p54_p0  ;;  %p140_p7 = scmp.lt.s32.totalorder %s861_s17, 3 }
   0xe   : > { %s1201_s22 = scalar_select %p945_p4, 1, 0 }
   0xf   : > { %s1202_s23 = scalar_select %p950_p6, 1, 0 }
  0x10   : > { %p955_p8 = pnand %p561_p5, %p140_p7  ;;  %s863_s25 = smov [#allocation5]  }
  0x11   : > { %s155_s26 = sshll.u32 %s863_s25, 4  ;;  %s864_s27 = smov [#allocation7]   ;;  %s156_s26 = int_to_ptr.vmem [resolvable:$true] %s155_s26 }
  0x12   : > { %s1203_s24 = scalar_select %p955_p8, 1, 0 }
  0x13   : > { %p592_p10 = pneg %p955_p8  ;;  %s166_s28 = sshll.u32 %s864_s27, 4  ;;  %s968_s28 = int_to_ptr.vmem [resolvable:$true] %s166_s28 }
  0x14   : > { %s689_s5 = scalar_lea.hbm %s1192_s1, 64 }
  0x15   : > { %p964_p11 = pnand %p592_p10, %p935_p1  ;;  %p690_p12 = scmp.ne.s32.totalorder %s1192_s1, %s689_s5 }
  0x16   : > { %p696_p5 = scmp.lt.u32.totalorder %s689_s5, %s1192_s1 }
  0x17   : > { %p691_p13 = pneg %p964_p11 }
  0x19   : > { %p692_p0 = pnand %p691_p13, %p690_p12 }
  0x1b   : > { %p693_p3 = pneg %p692_p0 }
  0x1d   : > { %p698_p7 = pnand %p696_p5, %p693_p3 }
  0x1f   : > { %701 = shalt.err (!%p698_p7)
}
  0x20   : > { %s702_s10 = scalar_lea.vmem %s156_s26, 64  ;;  %p710_p1 = scmp.lt.s32.totalorder %s156_s26, %s156_s26 }
  0x21   : > { %p703_p10 = scmp.ne.s32.totalorder %s156_s26, %s702_s10  ;;  %p711_p4 = scmp.lt.s32.totalorder %s702_s10, %s702_s10 }
  0x23   : > { %p705_p9 = pnand %p703_p10, %p691_p13  ;;  %p712_p8 = por %p711_p4, %p710_p1 }
  0x25   : > { %p706_p6 = pneg %p705_p9 }
  0x27   : > { %p713_p2 = pnand %p712_p8, %p706_p6 }
  0x29   : > { %716 = shalt.err (!%p713_p2)
}
  0x2a   : > { %595 = dma.hbm_to_vmem [thread:$0]  (!%p964_p11), %s1192_s1, 64, %s156_s26, [#allocation6]  }
  0x2b   : > { %s717_s27 = scalar_lea.hbm %s1193_s2, 128 }
  0x2c   : > { %p718_p9 = scmp.ne.s32.totalorder %s1193_s2, %s717_s27  ;;  %p724_p2 = scmp.lt.u32.totalorder %s717_s27, %s1193_s2 }
  0x2e   : > { %p720_p1 = pnand %p718_p9, %p691_p13 }
  0x30   : > { %p721_p4 = pneg %p720_p1 }
  0x32   : > { %p726_p6 = pnand %p724_p2, %p721_p4 }
  0x34   : > { %729 = shalt.err (!%p726_p6)
}
  0x35   : > { %s730_s26 = scalar_lea.vmem %s968_s28, 128  ;;  %p738_p3 = scmp.lt.s32.totalorder %s968_s28, %s968_s28 }
  0x36   : > { %p731_p8 = scmp.ne.s32.totalorder %s968_s28, %s730_s26  ;;  %p739_p5 = scmp.lt.s32.totalorder %s730_s26, %s730_s26 }
  0x38   : > { %p733_p12 = pnand %p731_p8, %p691_p13  ;;  %p740_p7 = por %p739_p5, %p738_p3 }
  0x3a   : > { %p734_p0 = pneg %p733_p12 }
  0x3c   : > { %p741_p10 = pnand %p740_p7, %p734_p0 }
  0x3e   : > { %744 = shalt.err (!%p741_p10)
}
  0x3f   : > { %598 = dma.hbm_to_vmem [thread:$0]  (!%p964_p11), %s1193_s2, 128, %s968_s28, [#allocation6]  }
  0x40   : > { %s32_s9 = sadd.s32 1, %s857_s16  ;;  %s41_s10 = sadd.s32 1, %s849_s14 }
  0x41   : > { %p34_p13 = scmp.ge.s32.totalorder %s32_s9, 2  ;;  %p48_p9 = scmp.ne.s32.totalorder %s849_s14, %s845_s13 }
  0x42   : > { %p49_p1 = scmp.eq.s32.totalorder %s861_s17, 0  ;;  %p609_p4 = scmp.lt.s32.totalorder %s861_s17, 2 }
  0x43   : > { %s1219_s9 = smov (%p34_p13, %s32_s9), 0  ;;  %p1205_p6 = scmp.ne.s32.totalorder %s1200_s21, 0 }
  0x44   : > { %p50_p2 = por %p49_p1, %p48_p9  ;;  %s36_s11 = ssub.s32 %s857_s16, %s1219_s9 }
  0x45   : > { %p1027_p8 = por %p1205_p6, %p48_p9  ;;  %s177_s18 = sand.u32 1, %s849_s14  }
  0x46   : > { %p39_p12 = scmp.eq.s32.totalorder %s36_s11, 0  ;;  %s565_s28 = sshll.u32 %s177_s18, 3 }
  0x47   : > { %s578_s19 = sshll.u32 %s857_s16, 7  ;;  %s181_s21 = scalar_lea.vmem [#allocation2], %s565_s28 }
  0x48   : > { %s1036_s25 = scalar_select %p39_p12, %s849_s14, %s41_s10  }
  0x49   : > { %s1041_s4 = scalar_lea.hbm %s1191_s0, %s578_s19  ;;  %s191_s5 = sshll.u32 %s181_s21, 4  ;;  %s1049_s5 = int_to_ptr.vmem [resolvable:$true] %s191_s5 }
  0x4a   : > { %p1045_p11 = pnand %p609_p4, %p50_p2  ;;  %s178_s26 = scalar_lea.sflag [#allocation3], %s177_s18 }
  0x4b   : > { %s745_s7 = scalar_lea.hbm %s1041_s4, 128  ;;  %s750_s11 = scalar_lea.hbm %s1191_s0, 256 }
  0x4c   : > { %p746_p0 = scmp.ne.s32.totalorder %s1041_s4, %s745_s7  ;;  %p747_p3 = pneg %p1045_p11 }
  0x4d   : > { %p751_p10 = scmp.lt.u32.totalorder %s1041_s4, %s1191_s0  ;;  %p752_p13 = scmp.lt.u32.totalorder %s750_s11, %s745_s7 }
  0x4e   : > { %p748_p5 = pnand %p747_p3, %p746_p0  ;;  %p754_p1 = scmp.lt.u32.totalorder %s745_s7, %s1041_s4 }
  0x4f   : > { %p753_p9 = por %p752_p13, %p751_p10 }
  0x50   : > { %p749_p7 = pneg %p748_p5 }
  0x51   : > { %p755_p4 = por %p754_p1, %p753_p9 }
  0x53   : > { %p756_p2 = pnand %p755_p4, %p749_p7 }
  0x55   : > { %759 = shalt.err (!%p756_p2)
}
  0x56   : > { %s760_s18 = scalar_lea.vmem %s1049_s5, 128  ;;  %s865_s27 = smov [#allocation2]  }
  0x57   : > { %p761_p6 = scmp.ne.s32.totalorder %s1049_s5, %s760_s18  ;;  %s765_s30 = sshll.u32 %s865_s27, 4  ;;  %s766_s30 = int_to_ptr.vmem [resolvable:$false] %s765_s30 }
  0x58   : > { %s767_s21 = scalar_lea.vmem %s766_s30, 256  ;;  %p768_p5 = scmp.lt.s32.totalorder %s1049_s5, %s766_s30 }
  0x59   : > { %p763_p12 = pnand %p761_p6, %p747_p3  ;;  %p769_p10 = scmp.lt.s32.totalorder %s767_s21, %s760_s18 }
  0x5b   : > { %p764_p0 = pneg %p763_p12  ;;  %p770_p13 = por %p769_p10, %p768_p5 }
  0x5d   : > { %p771_p9 = pnand %p770_p13, %p764_p0 }
  0x5f   : > { %774 = shalt.err (!%p771_p9)
}
  0x60   : > { %602 = dma.hbm_to_vmem [thread:$0]  (!%p1045_p11), %s1041_s4, 128, %s1049_s5, %s178_s26  }
  0x61   : > { %p1208_p7 = scmp.ne.s32.totalorder %s1203_s24, 0 }
  0x62   : > { %s1079_s7 = sand.u32 (!%p1208_p7), 1, %s845_s13   ;;  %p1209_p3 = scmp.ne.s32.totalorder (!%p1208_p7), %s1201_s22, 0 }
  0x63   : > { %200 = sbr.rel (%p1208_p7) target bundleno = 415 (0x19f), region = 32  ;;  %s569_s8 = sshll.u32 (!%p1208_p7), %s1079_s7, 3 }
  0x64   : > { %s203_s10 = scalar_lea.sflag (!%p1208_p7), [#allocation3], %s1079_s7  ;;  %s206_s11 = scalar_lea.vmem (!%p1208_p7), [#allocation2], %s569_s8 }
  0x6a   : > { %828 = dma.done.wait (%p1209_p3), %s203_s10, 128  }
  0x6b   : > { %830 = vsyncadd (%p1209_p3), %s203_s10, 4294967168  ;;  %p1210_p11 = scmp.ne.s32.totalorder %s1199_s20, 0 }
  0x6d   : > { %832 = dma.done.wait (%p1210_p11), [#allocation6], 192  }
  0x6e   : > { %834 = vsyncadd (%p1210_p11), [#allocation6], 4294967104  ;;  %v866_v0 = vmov 2   ;;  %v867_v1 = vmov 0   ;;  %v238_v2 = vld [vmem:[#allocation5] sm:$0xf]  ;;  %v247_v13 = vlaneseq }
  0x6f   : > { %679 = vset.pattern.permute.xlu1 %v866_v0  ;;  %677 = vset.pattern.permute.xlu0 %v867_v1  ;;  %v868_v3 = vmov 6   ;;  %v869_v4 = vmov 1   ;;  %v1093_v5 = vld [vmem:[%s206_s11] sm:$0xff]  ;;  %v870_v6 = vmov 7   ;;  %s871_s22 = smov 1   ;;  %v872_v7 = vmov 8  }
  0x70   : > { %316 = vperm.xlu1 %679, %v238_v2   ;;  %302 = vperm.xlu0 %677, %v238_v2   ;;  %v1098_v8 = vcombine.high %v1093_v5, %v1093_v5  ;;  %v873_v9 = vmov 4   ;;  %v874_v10 = vmov 3   ;;  %s875_s20 = smov 127   ;;  %v876_v11 = vmov 9   ;;  %v1106_v19 = vld [vmem:[#allocation7] sm:$0xff]  ;;  %s878_s24 = smov 112  }
  0x71   : > { %v877_v12 = vmov 5   ;;  %v1103_v16 = vshrl.u32 %v247_v13, 7  ;;  %v1108_v21 = vand.u32 127, %v247_v13  ;;  %s879_s4 = smov 16   ;;  %s579_s5 = sshll.u32 %s853_s15, 7 }
  0x72   : > { %s236_s6 = scalar_lea.vmem [#allocation8], %s569_s8  ;;  %s1142_s18 = scalar_lea.hbm %s1194_s3, %s579_s5 }
  0x73   : > { %v255_v18 = vsub.s32 0, %v1103_v16  ;;  %v259_v22 = vsub.s32 4, %v1103_v16  ;;  %vm249_vm0 = vcmp.lt.s32.totalorder %v1108_v21, 1  ;;  %v282_v25 = vsub.s32 1, %v1103_v16  ;;  %s454_s26 = sshll.u32 %s236_s6, 4  ;;  %s438_s27 = scalar_lea.sflag [#allocation4], %s1079_s7  ;;  %s1144_s26 = int_to_ptr.vmem [resolvable:$true] %s454_s26 }
  0x74   : > { %680 = vset.pattern.permute.xlu1 %v868_v3  ;;  %678 = vset.pattern.permute.xlu0 %v869_v4  ;;  %v286_v26 = vsub.s32 5, %v1103_v16  ;;  %vm277_vm1 = vcmp.lt.s32.totalorder %v1108_v21, 127  ;;  %vm377_vm2 = vcmp.lt.s32.totalorder %v1108_v21, 16  ;;  %vm406_vm3 = vcmp.lt.s32.totalorder %v1108_v21, 112  ;;  %s775_s30 = scalar_lea.vmem %s1144_s26, 128  ;;  %s880_s15 = smov [#allocation8]  }
  0x75   : > { %352 = vperm.xlu1 %680, %v238_v2   ;;  %308 = vperm.xlu0 %678, %v238_v2   ;;  %v256_v24 = vrot.slane %v1106_v19, %v255_v18  ;;  %v260_v27 = vrot.slane %v1106_v19, %v259_v22  ;;  %v283_v32 = vrot.slane %v1106_v19, %v282_v25  ;;  %v386_v22 = vsub.s32 6, %v1103_v16  ;;  %p776_p1 = scmp.ne.s32.totalorder %s1144_s26, %s775_s30  ;;  %s779_s21 = sshll.u32 %s880_s15, 4  ;;  %s780_s21 = int_to_ptr.vmem [resolvable:$false] %s779_s21 }
  0x76   : > { %v287_v33 = vrot.slane %v1106_v19, %v286_v26  ;;  %s781_s8 = scalar_lea.vmem %s780_s21, 256  ;;  %p782_p6 = scmp.lt.s32.totalorder %s1144_s26, %s780_s21 }
  0x77   : > { %v266_v29 = vrot.slane %v256_v24, %v255_v18  ;;  %v270_v34 = vrot.slane %v260_v27, %v255_v18  ;;  %v293_v38 = vrot.slane %v283_v32, %v282_v25  ;;  %p777_p4 = pnand %p776_p1, %p1027_p8  ;;  %p783_p12 = scmp.lt.s32.totalorder %s781_s8, %s775_s30 }
  0x78   : > { %v297_v39 = vrot.slane %v287_v33, %v282_v25  ;;  %v415_v25 = vsub.s32 7, %v1103_v16 }
  0x79   : > { %681 = vset.pattern.permute.xlu1 %v870_v6  ;;  %243 = vrot.lane.b32.xlu0 %v1093_v5, %s871_s22  ;;  %p778_p2 = pneg %p777_p4  ;;  %p784_p0 = por %p783_p12, %p782_p6 }
  0x7a   : > { %358 = vperm.xlu1 %681, %v238_v2   ;;  %682 = vset.pattern.permute.xlu0 %v872_v7 }
  0x7b   : > { %p785_p5 = pnand %p784_p0, %p778_p2 }
  0x7d   : > { %366 = vperm.xlu0 %682, %v238_v2  }
  0x7e   : > { %245 = vrot.lane.b32.xlu1 %v1098_v8, %s871_s22 }
  0x7f   : > { %684 = vset.pattern.permute.xlu1 %v873_v9 }
  0x81   : > { %683 = vset.pattern.permute.xlu0 %v874_v10 }
  0x82   : > { %324 = vperm.xlu0 %683, %v238_v2   ;;  %273 = vrot.lane.b32.xlu1 %v1093_v5, %s875_s20 }
  0x86   : > { %275 = vrot.lane.b32.xlu1 %v1098_v8, %s875_s20  ;;  %686 = vset.pattern.permute.xlu0 %v876_v11 }
  0x87   : > { %346 = vperm.xlu0 %686, %v238_v2  }
  0x8a   : > { %330 = vperm.xlu1 %684, %v238_v2  }
  0x8b   : > { %687 = vset.pattern.permute.xlu0 %v872_v7 }
  0x8e   : > { %685 = vset.pattern.permute.xlu1 %v877_v12 }
  0x8f   : > { %338 = vperm.xlu1 %685, %v238_v2  }
  0xef   : > { %v317_v14 = vpop.permute.xlu1 %316  ;;  %v303_v15 = vpop.permute.xlu0 %302 }
  0xf4   : > { %v353_v17 = vpop.permute.xlu1 %352  ;;  %v309_v20 = vpop.permute.xlu0 %308 }
  0xf5   : > { %v311_v42 = vmul.f32 %v309_v20, %v1093_v5  ;;  %v312_v51 = vmul.f32 %v309_v20, %v1098_v8  ;;  %v382_v20 = vsub.s32 2, %v1103_v16 }
  0xf7   : > { %v383_v24 = vrot.slane %v1106_v19, %v382_v20 }
  0xf8   : > { %v244_v28 = vpop.permute.xlu0 %243 }
  0xf9   : > { %v359_v23 = vpop.permute.xlu1 %358  ;;  %v393_v27 = vrot.slane %v383_v24, %v382_v20 }
  0xfa   : > { %v361_v48 = vmul.f32 %v359_v23, %v1093_v5  ;;  %v362_v4 = vmul.f32 %v359_v23, %v1098_v8  ;;  %v411_v23 = vsub.s32 3, %v1103_v16 }
  0xfc   : > { %v367_v40 = vpop.permute.xlu0 %366 }
  0xfd   : > { %v246_v30 = vpop.permute.xlu1 %245 }
  0xfe   : > { %v251_v31 = vsel %vm249_vm0, %v246_v30, %v244_v28  ;;  %v250_v35 = vsel %vm249_vm0, %v244_v28, %v246_v30  ;;  %v416_v30 = vrot.slane %v1106_v19, %v415_v25 }
  0xff   : > { %v271_v36 = vmul.f32 %v266_v29, %v251_v31  ;;  %v272_v41 = vmul.f32 %v270_v34, %v250_v35  ;;  %v412_v29 = vrot.slane %v1106_v19, %v411_v23 }
 0x101   : > { %v274_v37 = vpop.permute.xlu1 %273  ;;  %v305_v43 = vmul.f32 %v303_v15, %v271_v36  ;;  %v355_v44 = vmul.f32 %v353_v17, %v271_v36  ;;  %v306_v52 = vmul.f32 %v303_v15, %v272_v41  ;;  %v325_v58 = vpop.permute.xlu0 %324  ;;  %v356_v1 = vmul.f32 %v353_v17, %v272_v41 }
 0x102   : > { %v327_v2 = vmul.f32 %v325_v58, %v271_v36  ;;  %v328_v3 = vmul.f32 %v325_v58, %v272_v41  ;;  %v422_v16 = vrot.slane %v412_v29, %v411_v23 }
 0x103   : > { %v363_v54 = vadd.f32 %v361_v48, %v355_v44  ;;  %v313_v56 = vadd.f32 %v311_v42, %v305_v43  ;;  %v314_v0 = vadd.f32 %v312_v51, %v306_v52  ;;  %v364_v18 = vadd.f32 %v362_v4, %v356_v1 }
 0x105   : > { %v276_v45 = vpop.permute.xlu1 %275 }
 0x106   : > { %v278_v46 = vsel %vm277_vm1, %v274_v37, %v276_v45  ;;  %v279_v47 = vsel %vm277_vm1, %v276_v45, %v274_v37  ;;  %v347_v31 = vpop.permute.xlu0 %346  ;;  %v426_v37 = vrot.slane %v416_v30, %v411_v23 }
 0x107   : > { %v298_v49 = vmul.f32 %v293_v38, %v278_v46  ;;  %v299_v50 = vmul.f32 %v297_v39, %v279_v47 }
 0x109   : > { %v331_v53 = vpop.permute.xlu1 %330  ;;  %v369_v55 = vmul.f32 %v367_v40, %v298_v49  ;;  %v319_v57 = vmul.f32 %v317_v14, %v298_v49  ;;  %v320_v59 = vmul.f32 %v317_v14, %v299_v50  ;;  %v370_v9 = vmul.f32 %v367_v40, %v299_v50 }
 0x10a   : > { %v333_v60 = vmul.f32 %v331_v53, %v1093_v5  ;;  %v334_v61 = vmul.f32 %v331_v53, %v1098_v8  ;;  %v387_v8 = vrot.slane %v1106_v19, %v386_v22 }
 0x10b   : > { %v371_v62 = vadd.f32 %v369_v55, %v363_v54  ;;  %v321_v63 = vadd.f32 %v319_v57, %v313_v56  ;;  %v322_v7 = vadd.f32 %v320_v59, %v314_v0  ;;  %v372_v17 = vadd.f32 %v370_v9, %v364_v18 }
 0x10c   : > { %v335_v10 = vadd.f32 %v333_v60, %v327_v2  ;;  %v336_v11 = vadd.f32 %v334_v61, %v328_v3  ;;  %v397_v28 = vrot.slane %v387_v8, %v382_v20 }
 0x10d   : > { %402 = vrot.lane.b32.xlu0 %v371_v62, %s878_s24  ;;  %373 = vrot.lane.b32.xlu1 %v321_v63, %s879_s4 }
 0x10e   : > { %v339_v6 = vpop.permute.xlu1 %338 }
 0x10f   : > { %v341_v12 = vmul.f32 %v339_v6, %v298_v49  ;;  %v342_v13 = vmul.f32 %v339_v6, %v299_v50 }
 0x111   : > { %375 = vrot.lane.b32.xlu1 %v322_v7, %s879_s4  ;;  %v343_v14 = vadd.f32 %v341_v12, %v335_v10  ;;  %v344_v15 = vadd.f32 %v342_v13, %v336_v11 }
 0x113   : > { %v349_v38 = vadd.f32 %v347_v31, %v343_v14  ;;  %v350_v39 = vadd.f32 %v347_v31, %v344_v15 }
 0x115   : > { %404 = vrot.lane.b32.xlu1 %v372_v17, %s878_s24 }
 0x17f   : > { %v374_v26 = vpop.permute.xlu1 %373  ;;  %v403_v40 = vpop.permute.xlu0 %402 }
 0x183   : > { %v376_v32 = vpop.permute.xlu1 %375 }
 0x184   : > { %v378_v33 = vsel %vm377_vm2, %v374_v26, %v376_v32  ;;  %v379_v34 = vsel %vm377_vm2, %v376_v32, %v374_v26 }
 0x185   : > { %v398_v35 = vmul.f32 %v393_v27, %v379_v34  ;;  %v399_v36 = vmul.f32 %v397_v28, %v378_v33 }
 0x187   : > { %v405_v41 = vpop.permute.xlu1 %404  ;;  %v400_v19 = vadd.f32 %v398_v35, %v349_v38  ;;  %v401_v44 = vadd.f32 %v399_v36, %v350_v39 }
 0x188   : > { %v407_v42 = vsel %vm406_vm3, %v403_v40, %v405_v41  ;;  %v408_v43 = vsel %vm406_vm3, %v405_v41, %v403_v40 }
 0x189   : > { %v427_v45 = vmul.f32 %v422_v16, %v407_v42  ;;  %v428_v46 = vmul.f32 %v426_v37, %v408_v43 }
 0x18b   : > { %v429_v47 = vadd.f32 %v427_v45, %v400_v19  ;;  %v430_v21 = vadd.f32 %v428_v46, %v401_v44 }
 0x18d   : > { %v433_v48 = vcombine.low %v429_v47, %v430_v21 }
 0x18f   : > { %v435_v49 = vmax.f32 %v1093_v5, %v433_v48 }
 0x191   : > { %436 = vst [vmem:[%s236_s6] sm:$0xff] %v435_v49 }
 0x192   : > { %788 = shalt.err (!%p785_p5)
}
 0x193   : > { %s789_s7 = scalar_lea.hbm %s1142_s18, 128  ;;  %s793_s22 = scalar_lea.hbm %s1194_s3, 256 }
 0x194   : > { %p790_p10 = scmp.ne.s32.totalorder %s1142_s18, %s789_s7  ;;  %p794_p7 = scmp.lt.u32.totalorder %s1142_s18, %s1194_s3 }
 0x195   : > { %p795_p3 = scmp.lt.u32.totalorder %s793_s22, %s789_s7  ;;  %p797_p1 = scmp.lt.u32.totalorder %s789_s7, %s1142_s18 }
 0x196   : > { %p791_p13 = pnand %p790_p10, %p1027_p8 }
 0x197   : > { %p796_p11 = por %p795_p3, %p794_p7 }
 0x198   : > { %p792_p9 = pneg %p791_p13 }
 0x199   : > { %p798_p4 = por %p797_p1, %p796_p11 }
 0x19b   : > { %p799_p2 = pnand %p798_p4, %p792_p9 }
 0x19d   : > { %802 = shalt.err (!%p799_p2)
}
 0x19e   : > { %590 = dma.vmem_to_hbm [thread:$0]  (%p1027_p8), %s1144_s26, 128, %s1142_s18, %s438_s27  }
 0x19f PF: > { %s466_s4 = sand.u32 1, %s841_s12   ;;  %p1211_p6 = scmp.ne.s32.totalorder %s1202_s23, 0 }
 0x1a0   : > { %p1212_p12 = scmp.ge.s32.totalorder %s861_s17, 2  ;;  %s467_s5 = scalar_lea.sflag [#allocation4], %s466_s4 }
 0x1a2   : > { %p604_p0 = pnand %p1212_p12, %p1211_p6 }
 0x1a4   : > { %836 = dma.done.wait (!%p604_p0), %s467_s5, 128  }
 0x1a5   : > { %838 = vsyncadd (!%p604_p0), %s467_s5, 4294967168  ;;  %s20_s17 = sadd.s32 1, %s861_s17   ;;  %s1213_s12 = smov %s845_s13 }
 0x1a6   : > { %p17_p5 = scmp.ge.s32.totalorder %s20_s17, 4   ;;  %s1214_s13 = smov %s849_s14 }
 0x1a7   : > { %s1215_s14 = smov %s1036_s25  ;;  %s1216_s15 = smov %s857_s16 }
 0x1a8   : > { %s1217_s16 = smov %s1219_s9  ;;  %19 = sbr.rel (!%p17_p5) target bundleno = 7 (0x7), region = 86 }
 0x1af   :  { %472 = vsyncpa [#allocation3], 1 }
 0x1b0   :  { %474 = vsyncpa [#allocation3 + $0x1], 1 }
 0x1b1   :  { %475 = vsyncpa [#allocation6], 1 }
 0x1b2   :  { %476 = vsyncpa [#allocation4], 1 }
 0x1b3   :  { %478 = vsyncpa [#allocation4 + $0x1], 1 }

</bundles_post_ra>
